<compile_context>
chip_gen: v6e
topology: v6e:2x2x1
jax: 0.10.0
libtpu: 0.0.40
codegen_flags: <defaults>
</compile_context>

<pallas_src>
import math
import functools

import jax
import jax.numpy as jnp
from jax import lax
from jax.experimental import pallas as pl
from jax.experimental.pallas import tpu as pltpu


# ----------------------------------------------------------------------------
# helpers
# ----------------------------------------------------------------------------
def _sublane_multiple(dtype):
    return {4: 8, 2: 16, 1: 32}.get(jnp.dtype(dtype).itemsize, 8)


def _pick_tile(n, target, dtype=jnp.float32):
    """Largest tile <= target dividing n that is a multiple of the sublane
    quantum for `dtype`; otherwise fall back to the full extent (always a
    legal block)."""
    q = _sublane_multiple(dtype)
    target = min(n, target)
    for t in range(target, q - 1, -1):
        if n % t == 0 and t % q == 0:
            return t
    return n


def _pick_head_group(heads, dim_head):
    """Smallest head-group so the fused lane block (group*dim_head) is a
    multiple of 128 lanes; if the full fused-head dim is not a multiple of
    128, use all heads (block == full dim, always legal)."""
    if (heads * dim_head) % 128 == 0:
        for g in range(1, heads + 1):
            if heads % g == 0 and (g * dim_head) % 128 == 0:
                return g
    return heads


# ----------------------------------------------------------------------------
# Pallas kernels
# ----------------------------------------------------------------------------
def _q_proj_kernel(x_ref, w_ref, q_ref, *, scale):
    # x: (1, tm, Cq), w: (Cq, H*d) -> q: (1, tm, H*d), softmax scale folded in.
    q_ref[0] = (jnp.dot(x_ref[0], w_ref[...],
                        preferred_element_type=jnp.float32) * scale
                ).astype(q_ref.dtype)


def _kv_proj_kernel(c_ref, wk_ref, wv_ref, k_ref, v_ref):
    # context: (1, tm, Cc), wk/wv: (Cc, H*d) -> k/v: (1, tm, H*d)
    c = c_ref[0]
    k_ref[0] = jnp.dot(c, wk_ref[...],
                       preferred_element_type=jnp.float32).astype(k_ref.dtype)
    v_ref[0] = jnp.dot(c, wv_ref[...],
                       preferred_element_type=jnp.float32).astype(v_ref.dtype)


def _flash_attn_kernel(q_ref, k_ref, v_ref, o_ref, m_sc, l_sc, acc_sc,
                       *, hg, d, exp_dtype):
    # q: (1, tq, hg*d), k/v: (1, tk, hg*d) -> o: (1, tq, hg*d)
    # hg heads are processed per grid step (static unrolled loop); online
    # softmax state per head lives in fp32 VMEM scratch across the kv axis.
    ki = pl.program_id(3)

    @pl.when(ki == 0)
    def _():
        m_sc[...] = jnp.full_like(m_sc, -jnp.inf)
        l_sc[...] = jnp.zeros_like(l_sc)
        acc_sc[...] = jnp.zeros_like(acc_sc)

    q_full = q_ref[0]          # (tq, hg*d) -- scale already folded into q
    k_full = k_ref[0]          # (tk, hg*d)
    v_full = v_ref[0]          # (tk, hg*d)

    for hh in range(hg):       # static, small (typically 2)
        lo, hi = hh * d, (hh + 1) * d
        qh = q_full[:, lo:hi]
        kh = k_full[:, lo:hi]
        vh = v_full[:, lo:hi]

        # q @ k^T contracting the last dims (no materialized transpose).
        s = lax.dot_general(qh, kh, (((1,), (1,)), ((), ())),
                            preferred_element_type=jnp.float32)   # (tq, tk)

        m_prev = m_sc[hh]
        m_new = jnp.maximum(m_prev, jnp.max(s, axis=-1, keepdims=True))
        alpha = jnp.exp(m_prev - m_new)
        # bf16 exp on bf16 inputs (v6e/v7x EUP); fp32 otherwise.
        p = jnp.exp((s - m_new).astype(exp_dtype))
        l_sc[hh] = alpha * l_sc[hh] + jnp.sum(p, axis=-1, keepdims=True,
                                              dtype=jnp.float32)
        acc_sc[hh] = alpha * acc_sc[hh] + jnp.dot(
            p.astype(vh.dtype), vh, preferred_element_type=jnp.float32)
        m_sc[hh] = m_new

    @pl.when(ki == pl.num_programs(3) - 1)
    def _():
        outs = []
        for hh in range(hg):
            inv = pl.reciprocal(l_sc[hh], approx=False)   # exact, once/q-tile
            outs.append(acc_sc[hh] * inv)
        o_ref[0] = jnp.concatenate(outs, axis=-1).astype(o_ref.dtype)


def _out_proj_kernel(a_ref, w_ref, b_ref, o_ref):
    # a: (1, tm, H*d), w: (H*d, Cq), bias: (1, Cq) -> o: (1, tm, Cq)
    # Single matmul contracting the full fused-head dim (K = H*d).
    o_ref[0] = (jnp.dot(a_ref[0], w_ref[...],
                        preferred_element_type=jnp.float32)
                + b_ref[...].astype(jnp.float32)).astype(o_ref.dtype)


# ----------------------------------------------------------------------------
# Pallas wrappers
# ----------------------------------------------------------------------------
def project_q(x, w_q, scale, *, tm_target=256):
    """x: (B, N, Cq), w_q: (Cq, H*d) -> (B, N, H*d), pre-scaled by `scale`."""
    B, N, Cq = x.shape
    HD = w_q.shape[1]
    tm = _pick_tile(N, tm_target, x.dtype)
    kernel = functools.partial(_q_proj_kernel, scale=scale)
    return pl.pallas_call(
        kernel,
        out_shape=jax.ShapeDtypeStruct((B, N, HD), x.dtype),
        grid=(B, N // tm),
        in_specs=[
            pl.BlockSpec((1, tm, Cq), lambda b, mi: (b, mi, 0)),
            pl.BlockSpec((Cq, HD), lambda b, mi: (0, 0)),
        ],
        out_specs=pl.BlockSpec((1, tm, HD), lambda b, mi: (b, mi, 0)),
        compiler_params=pltpu.CompilerParams(
            dimension_semantics=("parallel", "parallel")),
    )(x, w_q)


def project_kv(context, w_k, w_v, *, tm_target=256):
    """context: (B, Nk, Cc), w_k/w_v: (Cc, H*d) -> two (B, Nk, H*d)."""
    B, Nk, Cc = context.shape
    HD = w_k.shape[1]
    tm = _pick_tile(Nk, tm_target, context.dtype)
    out_sd = jax.ShapeDtypeStruct((B, Nk, HD), context.dtype)
    return pl.pallas_call(
        _kv_proj_kernel,
        out_shape=(out_sd, out_sd),
        grid=(B, Nk // tm),
        in_specs=[
            pl.BlockSpec((1, tm, Cc), lambda b, mi: (b, mi, 0)),
            pl.BlockSpec((Cc, HD), lambda b, mi: (0, 0)),
            pl.BlockSpec((Cc, HD), lambda b, mi: (0, 0)),
        ],
        out_specs=(
            pl.BlockSpec((1, tm, HD), lambda b, mi: (b, mi, 0)),
            pl.BlockSpec((1, tm, HD), lambda b, mi: (b, mi, 0)),
        ),
        compiler_params=pltpu.CompilerParams(
            dimension_semantics=("parallel", "parallel")),
    )(context, w_k, w_v)


def flash_attention(q, k, v, heads, dim_head, *, tq_target=128, tk_target=256):
    """q: (B, Nq, H*d) (pre-scaled), k/v: (B, Nk, H*d) -> (B, Nq, H*d)."""
    B, Nq, HD = q.shape
    Nk = k.shape[1]
    d = dim_head
    hg = _pick_head_group(heads, d)       # heads per grid step (lane-dense)
    gd = hg * d
    tq = _pick_tile(Nq, tq_target, q.dtype)
    tk = _pick_tile(Nk, tk_target, k.dtype)
    exp_dtype = jnp.bfloat16 if q.dtype == jnp.bfloat16 else jnp.float32
    kernel = functools.partial(_flash_attn_kernel, hg=hg, d=d,
                               exp_dtype=exp_dtype)
    itemsize = q.dtype.itemsize
    cost = pl.CostEstimate(
        flops=4 * B * heads * Nq * Nk * d,
        transcendentals=B * heads * Nq * Nk,
        bytes_accessed=(2 * q.size + k.size + v.size) * itemsize,
    )
    # Grid: (B, head-groups, Nq tiles) parallel (megacore), kv axis arbitrary.
    return pl.pallas_call(
        kernel,
        out_shape=jax.ShapeDtypeStruct((B, Nq, HD), q.dtype),
        grid=(B, heads // hg, Nq // tq, Nk // tk),
        in_specs=[
            pl.BlockSpec((1, tq, gd), lambda b, hs, qi, ki: (b, qi, hs)),
            pl.BlockSpec((1, tk, gd), lambda b, hs, qi, ki: (b, ki, hs)),
            pl.BlockSpec((1, tk, gd), lambda b, hs, qi, ki: (b, ki, hs)),
        ],
        out_specs=pl.BlockSpec((1, tq, gd), lambda b, hs, qi, ki: (b, qi, hs)),
        scratch_shapes=[
            pltpu.VMEM((hg, tq, 1), jnp.float32),   # running max
            pltpu.VMEM((hg, tq, 1), jnp.float32),   # running sum
            pltpu.VMEM((hg, tq, d), jnp.float32),   # output accumulator
        ],
        compiler_params=pltpu.CompilerParams(
            dimension_semantics=("parallel", "parallel", "parallel",
                                 "arbitrary")),
        cost_estimate=cost,
    )(q, k, v)


def out_projection(a, w_o, b_o, *, tm_target=256):
    """a: (B, N, H*d), w_o: (H*d, Cq), b_o: (Cq,) -> (B, N, Cq).

    The '(b h) n d -> b n (h d)' rearrange is already the memory layout of
    `a`, so this is a single full-K matmul per tile (no head reduction)."""
    B, N, HD = a.shape
    Cq = w_o.shape[1]
    tm = _pick_tile(N, tm_target, a.dtype)
    return pl.pallas_call(
        _out_proj_kernel,
        out_shape=jax.ShapeDtypeStruct((B, N, Cq), a.dtype),
        grid=(B, N // tm),
        in_specs=[
            pl.BlockSpec((1, tm, HD), lambda b, mi: (b, mi, 0)),
            pl.BlockSpec((HD, Cq), lambda b, mi: (0, 0)),
            pl.BlockSpec((1, Cq), lambda b, mi: (0, 0)),
        ],
        out_specs=pl.BlockSpec((1, tm, Cq), lambda b, mi: (b, mi, 0)),
        compiler_params=pltpu.CompilerParams(
            dimension_semantics=("parallel", "parallel")),
    )(a, w_o, b_o.reshape(1, Cq))


# ----------------------------------------------------------------------------
# CrossAttention module (JAX glue around the Pallas kernels)
# ----------------------------------------------------------------------------
class CrossAttention:
    def __init__(self, query_dim, context_dim=None, heads=8, dim_head=64,
                 dropout=0.0, key=None):
        inner_dim = dim_head * heads
        context_dim = query_dim if context_dim is None else context_dim
        self.scale = dim_head ** (-0.5)
        self.heads = heads
        self.dim_head = dim_head
        self.query_dim = query_dim
        self.inner_dim = inner_dim

        if key is None:
            key = jax.random.PRNGKey(0)
        k_q, k_k, k_v, k_o, k_ob = jax.random.split(key, 5)

        def init_w(rng, fan_in, shape):
            # PyTorch nn.Linear default: U(-1/sqrt(fan_in), 1/sqrt(fan_in)).
            bound = 1.0 / math.sqrt(fan_in)
            return jax.random.uniform(rng, shape, jnp.float32, -bound, bound)

        # Fused-head weight layout: columns ordered (head, dim) exactly like
        # the PyTorch 'b n (h d)' packing, so no rearranges are ever needed.
        self.w_q = init_w(k_q, query_dim, (query_dim, inner_dim))
        self.w_k = init_w(k_k, context_dim, (context_dim, inner_dim))
        self.w_v = init_w(k_v, context_dim, (context_dim, inner_dim))
        self.w_o = init_w(k_o, inner_dim, (inner_dim, query_dim))
        bound_o = 1.0 / math.sqrt(inner_dim)
        self.b_o = jax.random.uniform(k_ob, (query_dim,), jnp.float32,
                                      -bound_o, bound_o)
        # Dropout is identity in eval / for dropout=0.0.

    def __call__(self, x, context=None, mask=None):
        if mask is not None:
            # TODO(synk): mask path (masked_fill before softmax) not implemented.
            raise NotImplementedError("mask is not supported")
        context = x if context is None else context

        q = project_q(x, self.w_q, self.scale)            # (B, Nq, H*d), scaled
        k, v = project_kv(context, self.w_k, self.w_v)    # (B, Nk, H*d) each
        attn_out = flash_attention(q, k, v, self.heads, self.dim_head)
        return out_projection(attn_out, self.w_o, self.b_o)   # (B, Nq, Cq)


# ----------------------------------------------------------------------------
# Pure-JAX reference for sanity checking
# ----------------------------------------------------------------------------
def reference_forward(mod: CrossAttention, x, context=None):
    context = x if context is None else context
    H, d = mod.heads, mod.dim_head
    B, Nq, _ = x.shape
    Nk = context.shape[1]
    q = (x @ mod.w_q).reshape(B, Nq, H, d).transpose(0, 2, 1, 3)
    k = (context @ mod.w_k).reshape(B, Nk, H, d).transpose(0, 2, 1, 3)
    v = (context @ mod.w_v).reshape(B, Nk, H, d).transpose(0, 2, 1, 3)
    sim = jnp.einsum("bhid,bhjd->bhij", q, k) * mod.scale
    attn = jax.nn.softmax(sim, axis=-1)
    out = jnp.einsum("bhij,bhjd->bhid", attn, v)
    out = out.transpose(0, 2, 1, 3).reshape(B, Nq, H * d)
    return out @ mod.w_o + mod.b_o


# ----------------------------------------------------------------------------
# Main
# ----------------------------------------------------------------------------
if __name__ == "__main__":
    key = jax.random.PRNGKey(0)
    k_x, k_params = jax.random.split(key)

    # Small shapes: batch=2, seq=8, query_dim=32, heads=2, dim_head=16
    B, N, query_dim = 2, 8, 32
    heads, dim_head = 2, 16

    x = jax.random.normal(k_x, (B, N, query_dim), jnp.float32)

    mod = CrossAttention(query_dim=query_dim, heads=heads, dim_head=dim_head,
                         key=k_params)

    out = mod(x, context=None)          # self-attention (context defaults to x)
    out = jax.block_until_ready(out)

    ref = reference_forward(mod, x)
    assert out.shape == (B, N, query_dim), out.shape
    assert jnp.allclose(out, ref, atol=2e-3, rtol=2e-3), "mismatch vs reference"

    print("KERNEL_OK")
</pallas_src>

<mosaic_0001>
module attributes {stable_mosaic.version = 11 : i64} {
  func.func @_q_proj_kernel(%arg0: i32, %arg1: i32, %arg2: memref<1x8x32xf32, #tpu.memory_space<vmem>>, %arg3: memref<32x32xf32, #tpu.memory_space<vmem>>, %arg4: memref<1x8x32xf32, #tpu.memory_space<vmem>>) attributes {dimension_semantics = [#tpu.dimension_semantics<parallel>, #tpu.dimension_semantics<parallel>], iteration_bounds = array<i64: 2, 1>, scalar_prefetch = 0 : i64, scratch_operands = 0 : i64, tpu.core_type = #tpu.core_type<tc>, window_params = [{transform_indices = @transform_0, window_bounds = array<i64: 1, 8, 32>}, {pipeline_mode = #tpu.pipeline_mode<synchronous>, transform_indices = @transform_1, window_bounds = array<i64: 32, 32>}, {transform_indices = @transform_2, window_bounds = array<i64: 1, 8, 32>}]} {
    %c0 = arith.constant 0 : index
    %c0_0 = arith.constant 0 : index
    %c0_1 = arith.constant 0 : index
    %0 = vector.load %arg2[%c0, %c0_0, %c0_1] : memref<1x8x32xf32, #tpu.memory_space<vmem>>, vector<1x8x32xf32>
    %1 = vector.shape_cast %0 : vector<1x8x32xf32> to vector<8x32xf32>
    %c0_2 = arith.constant 0 : index
    %c0_3 = arith.constant 0 : index
    %2 = vector.load %arg3[%c0_2, %c0_3] : memref<32x32xf32, #tpu.memory_space<vmem>>, vector<32x32xf32>
    %cst = arith.constant dense<0.000000e+00> : vector<8x32xf32>
    %3 = tpu.matmul %1, %2, %cst {dimension_numbers = #tpu.dot_dimension_numbers<[1], [0], [0], [1], [0, 0, 1, 1], [], []>} : vector<8x32xf32>, vector<32x32xf32>, vector<8x32xf32> -> vector<8x32xf32>
    %cst_4 = arith.constant 2.500000e-01 : f32
    %4 = vector.broadcast %cst_4 : f32 to vector<8x32xf32>
    %5 = arith.mulf %3, %4 : vector<8x32xf32>
    %c0_5 = arith.constant 0 : index
    %c0_6 = arith.constant 0 : index
    %c0_7 = arith.constant 0 : index
    %6 = vector.load %arg4[%c0_5, %c0_6, %c0_7] : memref<1x8x32xf32, #tpu.memory_space<vmem>>, vector<1x8x32xf32>
    %7 = vector.shape_cast %6 : vector<1x8x32xf32> to vector<8x32xf32>
    %8 = vector.shape_cast %5 : vector<8x32xf32> to vector<1x8x32xf32>
    tpu.vector_store %arg4[%c0_5, %c0_6, %c0_7], %8 {strides = array<i32>} : memref<1x8x32xf32, #tpu.memory_space<vmem>>, vector<1x8x32xf32>,
    return
  }
  func.func @transform_0(%arg0: i32, %arg1: i32) -> (i32, i32, i32) {
    %c0_i32 = arith.constant 0 : i32
    %c0_i32_0 = arith.constant 0 : i32
    return %arg0, %arg1, %c0_i32 : i32, i32, i32
  }
  func.func @transform_1(%arg0: i32, %arg1: i32) -> (i32, i32) {
    %c0_i32 = arith.constant 0 : i32
    %c0_i32_0 = arith.constant 0 : i32
    %c0_i32_1 = arith.constant 0 : i32
    return %c0_i32, %c0_i32_0 : i32, i32
  }
  func.func @transform_2(%arg0: i32, %arg1: i32) -> (i32, i32, i32) {
    %c0_i32 = arith.constant 0 : i32
    %c0_i32_0 = arith.constant 0 : i32
    return %arg0, %arg1, %c0_i32 : i32, i32, i32
  }
}

</mosaic_0001>

<bundles_post_ra>
// kernel: tpu_custom_call.1
= control target key start
LH: loop header
LB: loop body
LE: loop exit
PB: predicated region body
PF: predicated region fallthrough
CT: control target
= control target key end

     0   :  { %7 = vsyncpa [#allocation3], 0  ;;  %s821_s0 = inlined_call_operand.hbm [shape: f32[2,8,32], index: 0, kind: input, shape index: {}]   ;;  %s822_s1 = inlined_call_operand.hbm [shape: f32[32,32], index: 1, kind: input, shape index: {}]   ;;  %s823_s2 = inlined_call_operand.hbm [shape: f32[2,8,32], index: 2, kind: output, shape index: {}]  }
   0x1   :  { %9 = vsyncpa [#allocation3 + $0x1], 0 }
   0x2   :  { %10 = vsyncpa [#allocation6], 0 }
   0x3   :  { %11 = vsyncpa [#allocation4], 0 }
   0x4   :  { %13 = vsyncpa [#allocation4 + $0x1], 0  ;;  %s648_s9 = smov 0   ;;  %s650_s10 = smov 0  }
   0x5   :  { %s652_s11 = smov 0   ;;  %s654_s12 = smov 0  }
   0x6   :  { %s656_s13 = smov 0   ;;  %s658_s14 = smov 0  }
   0x7 LB: > { %s377_s15 = sadd.s32 4294967295, %s624_s14   ;;  %s378_s16 = sadd.s32 4294967294, %s624_s14   ;;  %s624_s14 = sphi %s658_s14, %s19_s14   ;;  %s620_s13 = sphi %s656_s13, %s841_s13   ;;  %s616_s12 = sphi %s654_s12, %s840_s12   ;;  %s612_s11 = sphi %s652_s11, %s839_s11   ;;  %s608_s10 = sphi %s650_s10, %s838_s10   ;;  %s604_s9 = sphi %s648_s9, %s837_s9  }
   0x8   : > { %p53_p0 = scmp.ne.s32.totalorder %s608_s10, %s604_s9  ;;  %p682_p1 = scmp.eq.s32.totalorder %s377_s15, 0 }
   0x9   : > { %p686_p2 = scmp.eq.s32.totalorder %s377_s15, 1  ;;  %p106_p3 = scmp.eq.s32.totalorder %s378_s16, 1 }
   0xa   : > { %p692_p4 = por %p682_p1, %p53_p0  ;;  %p379_p5 = scmp.ge.s32.totalorder %s624_s14, 1 }
   0xb   : > { %p697_p6 = por %p106_p3, %p53_p0  ;;  %p113_p7 = scmp.lt.s32.totalorder %s624_s14, 3 }
   0xc   : > { %s827_s19 = scalar_select %p692_p4, 1, 0 }
   0xd   : > { %s828_s20 = scalar_select %p697_p6, 1, 0 }
   0xe   : > { %p702_p8 = pnand %p379_p5, %p113_p7  ;;  %s626_s22 = smov [#allocation5]  }
   0xf   : > { %s125_s23 = sshll.u32 %s626_s22, 4  ;;  %s31_s25 = sadd.s32 1, %s620_s13  ;;  %s126_s23 = int_to_ptr.vmem [resolvable:$true] %s125_s23 }
  0x10   : > { %p417_p9 = pneg %p702_p8  ;;  %s497_s26 = scalar_lea.vmem %s126_s23, 512 }
  0x11   : > { %p498_p13 = scmp.ne.s32.totalorder %s126_s23, %s497_s26  ;;  %p505_p5 = scmp.lt.s32.totalorder %s126_s23, %s126_s23 }
  0x12   : > { %p711_p11 = pnand %p417_p9, %p682_p1  ;;  %p506_p7 = scmp.lt.s32.totalorder %s497_s26, %s497_s26 }
  0x14   : > { %p488_p12 = pneg %p711_p11  ;;  %p507_p6 = por %p506_p7, %p505_p5 }
  0x16   : > { %p500_p0 = pnand %p498_p13, %p488_p12 }
  0x18   : > { %p501_p3 = pneg %p500_p0 }
  0x1a   : > { %p508_p4 = pnand %p507_p6, %p501_p3 }
  0x1c   : > { %511 = shalt.err (!%p508_p4)
}
  0x1d   : > { %s627_s27 = smov 128   ;;  %s628_s28 = smov 8  }
  0x1e   : > { %420 = dma.hbm_to_vmem [thread:$0]  (!%p711_p11), %s822_s1, 512, %s126_s23, [#allocation6], %s627_s27, %s627_s27, %s628_s28  }
  0x1f   : > { %p33_p6 = scmp.ge.s32.totalorder %s31_s25, 2  ;;  %s40_s3 = sadd.s32 1, %s612_s11 }
  0x20   : > { %p47_p4 = scmp.ne.s32.totalorder %s612_s11, %s608_s10  ;;  %p48_p9 = scmp.eq.s32.totalorder %s624_s14, 0 }
  0x21   : > { %s843_s25 = smov (%p33_p6, %s31_s25), 0  ;;  %p430_p0 = scmp.lt.s32.totalorder %s624_s14, 2 }
  0x22   : > { %p729_p12 = por %p48_p9, %p47_p4  ;;  %p735_p13 = por %p686_p2, %p47_p4 }
  0x23   : > { %s35_s6 = ssub.s32 %s620_s13, %s843_s25  ;;  %s139_s7 = sand.u32 1, %s612_s11  }
  0x24   : > { %p38_p11 = scmp.eq.s32.totalorder %s35_s6, 0  ;;  %s382_s8 = sshll.u32 %s139_s7, 3 }
  0x25   : > { %s383_s16 = sshll.u32 %s620_s13, 7  ;;  %s143_s26 = scalar_lea.vmem [#allocation2], %s382_s8 }
  0x26   : > { %s744_s15 = scalar_select %p38_p11, %s612_s11, %s40_s3  }
  0x27   : > { %s149_s24 = scalar_lea.hbm %s821_s0, %s383_s16  ;;  %s151_s27 = sshll.u32 %s143_s26, 4  ;;  %s152_s27 = int_to_ptr.vmem [resolvable:$true] %s151_s27 }
  0x28   : > { %p752_p2 = pnand %p430_p0, %p729_p12  ;;  %s140_s28 = scalar_lea.sflag [#allocation3], %s139_s7 }
  0x29   : > { %s525_s29 = scalar_lea.vmem %s152_s27, 128  ;;  %s629_s30 = smov [#allocation2]  }
  0x2a   : > { %p514_p3 = pneg %p752_p2  ;;  %p526_p5 = scmp.ne.s32.totalorder %s152_s27, %s525_s29 }
  0x2b   : > { %s530_s3 = sshll.u32 %s629_s30, 4  ;;  %s531_s3 = int_to_ptr.vmem [resolvable:$false] %s530_s3 }
  0x2c   : > { %p528_p7 = pnand %p526_p5, %p514_p3  ;;  %s532_s6 = scalar_lea.vmem %s531_s3, 256 }
  0x2d   : > { %p533_p4 = scmp.lt.s32.totalorder %s152_s27, %s531_s3  ;;  %p534_p9 = scmp.lt.s32.totalorder %s532_s6, %s525_s29 }
  0x2e   : > { %p529_p6 = pneg %p528_p7 }
  0x2f   : > { %p535_p11 = por %p534_p9, %p533_p4 }
  0x31   : > { %p536_p10 = pnand %p535_p11, %p529_p6 }
  0x33   : > { %539 = shalt.err (!%p536_p10)
}
  0x34   : > { %424 = dma.hbm_to_vmem [thread:$0]  (!%p752_p2), %s149_s24, 128, %s152_s27, %s140_s28  }
  0x35   : > { %160 = sbr.rel (%p702_p8) target bundleno = 278 (0x116), region = 28  ;;  %s763_s4 = sand.u32 (!%p702_p8), 1, %s608_s10  }
  0x36   : > { %s385_s7 = sshll.u32 (!%p702_p8), %s763_s4, 3  ;;  %s163_s8 = scalar_lea.sflag (!%p702_p8), [#allocation3], %s763_s4 }
  0x37   : > { %s166_s16 = scalar_lea.vmem (!%p702_p8), [#allocation2], %s385_s7  ;;  %p834_p12 = scmp.ne.s32.totalorder (!%p702_p8), %s827_s19, 0 }
  0x3a   : > { %591 = dma.done.wait (%p834_p12), %s163_s8, 128  }
  0x3b   : > { %593 = vsyncadd (%p834_p12), %s163_s8, 4294967168 }
  0x3c   : > { %595 = dma.done.wait (%p682_p1), [#allocation6], 512  }
  0x3d   : > { %597 = vsyncadd (%p682_p1), [#allocation6], 4294966784  ;;  %v630_v0 = vmov 0.0   ;;  %vm631_vm0 = vmmov 0   ;;  %v195_v1 = vld [vmem:[#allocation5 + $0x18] sm:$0xff]  ;;  %v194_v2 = vld [vmem:[#allocation5 + $0x10] sm:$0xff] }
  0x3e   : > { %398 = vmatprep.subr.mxu0 %v630_v0  ;;  %406 = vmatprep.mubr.msk.f32.mxu0 %vm631_vm0, %v630_v0  ;;  %v193_v3 = vld [vmem:[#allocation5 + $0x8] sm:$0xff]  ;;  %v192_v4 = vld [vmem:[#allocation5] sm:$0xff]  ;;  %v191_v5 = vld [vmem:[%s166_s16] sm:$0xff]  ;;  %vm196_vm1 = vcmask 261120   ;;  %s390_s17 = sshll.u32 %s616_s12, 7  ;;  %s190_s19 = scalar_lea.vmem [#allocation7], %s385_s7 }
  0x3f   : > { %399 = vmatpush3.msra.mxu0 %v195_v1  ;;  %s287_s21 = sshll.u32 %s190_s19, 4  ;;  %s779_s24 = scalar_lea.hbm %s823_s2, %s390_s17  ;;  %s288_s21 = int_to_ptr.vmem [resolvable:$true] %s287_s21 }
  0x40   : > { %400 = vmatprep.subr.mxu0 %v630_v0  ;;  %s273_s26 = scalar_lea.sflag [#allocation4], %s763_s4  ;;  %s540_s27 = scalar_lea.vmem %s288_s21, 128 }
  0x41   : > { %401 = vmatpush3.msra.mxu0 %v194_v2  ;;  %p541_p1 = scmp.ne.s32.totalorder %s288_s21, %s540_s27  ;;  %s632_s18 = smov [#allocation7]  }
  0x42   : > { %402 = vmatprep.subr.mxu0 %v630_v0  ;;  %s544_s12 = sshll.u32 %s632_s18, 4  ;;  %s545_s12 = int_to_ptr.vmem [resolvable:$false] %s544_s12 }
  0x43   : > { %403 = vmatpush3.msra.mxu0 %v193_v3  ;;  %p542_p8 = pnand %p541_p1, %p735_p13  ;;  %s546_s28 = scalar_lea.vmem %s545_s12, 256 }
  0x44   : > { %404 = vmatprep.subr.mxu0 %v630_v0  ;;  %p547_p0 = scmp.lt.s32.totalorder %s288_s21, %s545_s12  ;;  %p548_p2 = scmp.lt.s32.totalorder %s546_s28, %s540_s27 }
  0x45   : > { %405 = vmatpush3.msra.mxu0 %v192_v4  ;;  %p543_p10 = pneg %p542_p8 }
  0x46   : > { %407 = vmatmul.mubr.msk.f32.vlgmr.msra.gmra.mxu0 %vm196_vm1, %v191_v5  ;;  %p549_p3 = por %p548_p2, %p547_p0 }
  0x48   : > { %p550_p5 = pnand %p549_p3, %p543_p10 }
 0x106   : > { %v266_v6 = vpop.f32.mrf.mxu0 }
 0x107   : > { %v270_v7 = vmul.f32 0.25, %v266_v6 }
 0x108   : > { %v408_v8 = vpop.f32.mrf.mxu0 }
 0x109   : > { %271 = vst.msk [vmem:[%s190_s19] sm:$0xff] %vm196_vm1, %v270_v7 }
 0x10a   : > { %553 = shalt.err (!%p550_p5)
}
 0x10b   : > { %s554_s29 = scalar_lea.hbm %s779_s24, 128  ;;  %s558_s6 = scalar_lea.hbm %s823_s2, 256 }
 0x10c   : > { %p555_p7 = scmp.ne.s32.totalorder %s779_s24, %s554_s29  ;;  %p559_p9 = scmp.lt.s32.totalorder %s779_s24, %s823_s2 }
 0x10d   : > { %p560_p11 = scmp.lt.s32.totalorder %s558_s6, %s554_s29 }
 0x10e   : > { %p556_p6 = pnand %p555_p7, %p735_p13 }
 0x10f   : > { %p561_p12 = por %p560_p11, %p559_p9 }
 0x110   : > { %p557_p4 = pneg %p556_p6 }
 0x112   : > { %p562_p1 = pnand %p561_p12, %p557_p4 }
 0x114   : > { %565 = shalt.err (!%p562_p1)
}
 0x115   : > { %415 = dma.vmem_to_hbm [thread:$0]  (%p735_p13), %s288_s21, 128, %s779_s24, %s273_s26  }
 0x116 PF: > { %s299_s8 = sand.u32 1, %s604_s9   ;;  %p835_p8 = scmp.ne.s32.totalorder %s828_s20, 0 }
 0x117   : > { %p836_p10 = scmp.ge.s32.totalorder %s624_s14, 2  ;;  %s300_s16 = scalar_lea.sflag [#allocation4], %s299_s8 }
 0x119   : > { %p426_p0 = pnand %p836_p10, %p835_p8 }
 0x11b   : > { %p427_p2 = pneg %p426_p0 }
 0x11d   : > { %599 = dma.done.wait (%p427_p2), %s300_s16, 128  }
 0x11e   : > { %601 = vsyncadd (%p427_p2), %s300_s16, 4294967168  ;;  %s19_s14 = sadd.s32 1, %s624_s14   ;;  %s837_s9 = smov %s608_s10 }
 0x11f   : > { %p16_p3 = scmp.ge.s32.totalorder %s19_s14, 4   ;;  %s838_s10 = smov %s612_s11 }
 0x120   : > { %s839_s11 = smov %s744_s15  ;;  %s840_s12 = smov %s620_s13 }
 0x121   : > { %s841_s13 = smov %s843_s25  ;;  %18 = sbr.rel (!%p16_p3) target bundleno = 7 (0x7), region = 77 }
 0x126   :  { %305 = vsyncpa [#allocation3], 1 }
 0x127   :  { %307 = vsyncpa [#allocation3 + $0x1], 1 }
 0x128   :  { %308 = vsyncpa [#allocation6], 1 }
 0x129   :  { %309 = vsyncpa [#allocation4], 1 }
 0x12a   :  { %311 = vsyncpa [#allocation4 + $0x1], 1 }

</bundles_post_ra>
